<compile_context>
chip_gen: v7x
topology: tpu7x:2x2x1
jax: 0.10.0
libtpu: 0.0.40
codegen_flags: <defaults>
</compile_context>

<pallas_src>
import functools

import jax
import jax.numpy as jnp
from jax.experimental import pallas as pl
from jax.experimental.pallas import tpu as pltpu


def _round_up(a, m):
    return (a + m - 1) // m * m


def capsule_loss_kernel(x_ref, labels_ref, recon_ref, img_ref, out_ref, *,
                        num_classes, caps_dim, num_channels, spatial):
    tb = recon_ref.shape[0]          # batch-tile rows (multiple of 8)
    d = spatial                      # lane-padded spatial size (multiple of 128)

    # ---- margin loss (tiny fraction of HBM bytes) -> per-row column, no scalar reduce ----
    x = x_ref[...].astype(jnp.float32)                          # (TB, NC*CD)
    labels = labels_ref[...].astype(jnp.float32)                # (TB, NC)
    x2 = x * x
    margin_col = jnp.zeros((tb, 1), jnp.float32)
    for c in range(num_classes):
        ss = jnp.sum(x2[:, c * caps_dim:(c + 1) * caps_dim], axis=1, keepdims=True)  # (TB, 1)
        v_c = jnp.sqrt(ss)
        lab = labels[:, c:c + 1]                                # (TB, 1)
        left = jnp.maximum(0.9 - v_c, 0.0)                      # relu(0.9 - v_c)
        right = jnp.maximum(v_c - 0.1, 0.0)                     # relu(v_c - 0.1)
        margin_col = margin_col + lab * left + 0.5 * (1.0 - lab) * right

    # ---- reconstruction loss partial (dominant HBM traffic) ----
    # Channel sum via static, lane-aligned slices of the channel-flattened image: pure VPU adds.
    img = img_ref[:, 0:d].astype(jnp.float32)
    for c in range(1, num_channels):
        img = img + img_ref[:, c * d:(c + 1) * d].astype(jnp.float32)
    diff = recon_ref[...].astype(jnp.float32) - img             # (TB, D)
    d2 = diff * diff

    # Reduce (TB, D) -> (8, 128) with VPU-only, vreg-aligned adds (no XLU, no scalar carry).
    acc_rows = d2[0:8, :]                                       # (8, D)
    m8 = margin_col[0:8, :]                                     # (8, 1)
    for g in range(1, tb // 8):
        acc_rows = acc_rows + d2[g * 8:(g + 1) * 8, :]
        m8 = m8 + margin_col[g * 8:(g + 1) * 8, :]
    acc = acc_rows[:, 0:128]                                    # (8, 128)
    for g in range(1, d // 128):
        acc = acc + acc_rows[:, g * 128:(g + 1) * 128]

    # Combine: scale recon partial, inject the margin column into lane 0 of the block.
    lane = jax.lax.broadcasted_iota(jnp.int32, (8, 128), 1)
    out_ref[...] = 0.0005 * acc + jnp.where(lane == 0, m8, 0.0)


def capsule_loss(x, labels, reconstructions, images, *, tile_b=512):
    """x: (B,NC,CD), labels: (B,NC), reconstructions: (B,H*W), images: (B,C,H,W)."""
    B, NC, CD = x.shape
    _, C, H, W = images.shape
    D = H * W
    D_pad = _round_up(max(D, 128), 128)

    # Flatten capsules into lanes; flatten images to (B, C, D), pad spatial to a lane multiple,
    # then flatten channels into lanes.
    x_flat = x.reshape(B, NC * CD)
    images3 = images.reshape(B, C, D)
    recon = reconstructions.reshape(B, D)
    if D_pad != D:
        images3 = jnp.pad(images3, ((0, 0), (0, 0), (0, D_pad - D)))
        recon = jnp.pad(recon, ((0, 0), (0, D_pad - D)))
    images_flat = images3.reshape(B, C * D_pad)

    # Batch tile: multiple of 8, sized from the PADDED VMEM footprint per row so double-buffered
    # inputs stay well under the scoped-VMEM limit on every generation (v7x: 64 MiB physical).
    bytes_per_row = 4 * (C * D_pad + D_pad
                         + _round_up(max(NC * CD, 128), 128)
                         + _round_up(max(NC, 128), 128))
    vmem_input_budget = 16 * 1024 * 1024
    max_tb = max(8, (vmem_input_budget // (2 * bytes_per_row)) // 8 * 8)
    TB = max(8, min(tile_b, max_tb, _round_up(B, 8)))

    Bp = _round_up(B, TB)
    pad_b = Bp - B
    if pad_b:
        # Zero rows contribute exactly 0 to both loss terms (labels=0, x=0, recon=img=0).
        x_flat = jnp.pad(x_flat, ((0, pad_b), (0, 0)))
        labels = jnp.pad(labels, ((0, pad_b), (0, 0)))
        recon = jnp.pad(recon, ((0, pad_b), (0, 0)))
        images_flat = jnp.pad(images_flat, ((0, pad_b), (0, 0)))

    num_tiles = Bp // TB
    kernel = functools.partial(capsule_loss_kernel, num_classes=NC, caps_dim=CD,
                               num_channels=C, spatial=D_pad)

    partials = pl.pallas_call(
        kernel,
        out_shape=jax.ShapeDtypeStruct((num_tiles * 8, 128), jnp.float32),
        grid=(num_tiles,),
        in_specs=[
            pl.BlockSpec((TB, NC * CD), lambda i: (i, 0)),       # x (capsules flattened to lanes)
            pl.BlockSpec((TB, NC), lambda i: (i, 0)),            # labels
            pl.BlockSpec((TB, D_pad), lambda i: (i, 0)),         # reconstructions
            pl.BlockSpec((TB, C * D_pad), lambda i: (i, 0)),     # images (channel-flat)
        ],
        out_specs=pl.BlockSpec((8, 128), lambda i: (i, 0)),
        compiler_params=pltpu.CompilerParams(
            dimension_semantics=("parallel",),                   # lets v7x shard tiles over 2 TCs
            vmem_limit_bytes=32 * 1024 * 1024,
        ),
    )(x_flat, labels, recon, images_flat)

    # Tiny final reduce in plain XLA; divisor is the ORIGINAL batch size.
    return jnp.sum(partials) / jnp.float32(B)


def capsule_loss_ref(x, labels, reconstructions, images):
    """Pure-JAX reference mirroring the PyTorch forward."""
    B = x.shape[0]
    img = images.sum(axis=1).reshape(B, -1)
    v_c = jnp.sqrt(jnp.sum(x ** 2, axis=2, keepdims=True))
    left = jnp.maximum(0.9 - v_c, 0.0).reshape(B, -1)
    right = jnp.maximum(v_c - 0.1, 0.0).reshape(B, -1)
    margin = jnp.sum(labels * left + 0.5 * (1.0 - labels) * right)
    recon = jnp.sum((reconstructions - img) ** 2)
    return (margin + 0.0005 * recon) / B


def _make_inputs(key, B, NC, CD, C, H, W):
    k1, k2, k3, k4 = jax.random.split(key, 4)
    x = jax.random.normal(k1, (B, NC, CD), dtype=jnp.float32) * 0.3
    label_idx = jax.random.randint(k2, (B,), 0, NC)
    labels = jax.nn.one_hot(label_idx, NC, dtype=jnp.float32)
    reconstructions = jax.random.uniform(k3, (B, H * W), dtype=jnp.float32)
    images = jax.random.uniform(k4, (B, C, H, W), dtype=jnp.float32)
    return x, labels, reconstructions, images


if __name__ == "__main__":
    B, NUM_CLASSES, CAPS_DIM = 2, 4, 16
    C, H, W = 4, 16, 16

    key = jax.random.PRNGKey(0)
    x, labels, reconstructions, images = _make_inputs(key, B, NUM_CLASSES, CAPS_DIM, C, H, W)

    loss = capsule_loss(x, labels, reconstructions, images)
    jax.block_until_ready(loss)
    ref = capsule_loss_ref(x, labels, reconstructions, images)
    assert jnp.allclose(loss, ref, rtol=1e-5, atol=1e-5), (loss, ref)

    # Second check: non-multiple-of-tile batch -> exercises multi-tile grid + zero padding.
    x2, l2, r2, i2 = _make_inputs(jax.random.PRNGKey(0), 20, NUM_CLASSES, CAPS_DIM, C, H, W)
    loss2 = capsule_loss(x2, l2, r2, i2, tile_b=8)
    jax.block_until_ready(loss2)
    ref2 = capsule_loss_ref(x2, l2, r2, i2)
    assert jnp.allclose(loss2, ref2, rtol=1e-5, atol=1e-5), (loss2, ref2)

    print("KERNEL_OK")
</pallas_src>

<mosaic_0001>
module attributes {stable_mosaic.version = 11 : i64} {
  func.func @capsule_loss_kernel(%arg0: i32, %arg1: memref<8x64xf32, #tpu.memory_space<vmem>>, %arg2: memref<8x4xf32, #tpu.memory_space<vmem>>, %arg3: memref<8x256xf32, #tpu.memory_space<vmem>>, %arg4: memref<8x1024xf32, #tpu.memory_space<vmem>>, %arg5: memref<8x128xf32, #tpu.memory_space<vmem>>) attributes {dimension_semantics = [#tpu.dimension_semantics<parallel>], iteration_bounds = array<i64: 1>, scalar_prefetch = 0 : i64, scratch_operands = 0 : i64, tpu.core_type = #tpu.core_type<tc>, window_params = [{transform_indices = @transform_0, window_bounds = array<i64: 8, 64>}, {transform_indices = @transform_1, window_bounds = array<i64: 8, 4>}, {transform_indices = @transform_2, window_bounds = array<i64: 8, 256>}, {transform_indices = @transform_3, window_bounds = array<i64: 8, 1024>}, {transform_indices = @transform_4, window_bounds = array<i64: 8, 128>}]} {
    %c0 = arith.constant 0 : index
    %c0_0 = arith.constant 0 : index
    %0 = vector.load %arg1[%c0, %c0_0] : memref<8x64xf32, #tpu.memory_space<vmem>>, vector<8x64xf32>
    %c0_1 = arith.constant 0 : index
    %c0_2 = arith.constant 0 : index
    %1 = vector.load %arg2[%c0_1, %c0_2] : memref<8x4xf32, #tpu.memory_space<vmem>>, vector<8x4xf32>
    %2 = arith.mulf %0, %0 : vector<8x64xf32>
    %cst = arith.constant 0.000000e+00 : f32
    %3 = vector.broadcast %cst : f32 to vector<8x1xf32>
    %4 = vector.extract_strided_slice %2 {offsets = [0, 0], sizes = [8, 16], strides = [1, 1]} : vector<8x64xf32> to vector<8x16xf32>
    %cst_3 = arith.constant dense<0.000000e+00> : vector<8xf32>
    %5 = vector.multi_reduction <add>, %4, %cst_3 [1] : vector<8x16xf32> to vector<8xf32>
    %6 = vector.shape_cast %5 : vector<8xf32> to vector<8x1xf32>
    %7 = math.sqrt %6 : vector<8x1xf32>
    %8 = vector.extract_strided_slice %1 {offsets = [0, 0], sizes = [8, 1], strides = [1, 1]} : vector<8x4xf32> to vector<8x1xf32>
    %cst_4 = arith.constant 0.899999976 : f32
    %9 = vector.broadcast %cst_4 : f32 to vector<8x1xf32>
    %10 = arith.subf %9, %7 : vector<8x1xf32>
    %cst_5 = arith.constant 0.000000e+00 : f32
    %11 = vector.broadcast %cst_5 : f32 to vector<8x1xf32>
    %12 = arith.maximumf %10, %11 : vector<8x1xf32>
    %cst_6 = arith.constant 1.000000e-01 : f32
    %13 = vector.broadcast %cst_6 : f32 to vector<8x1xf32>
    %14 = arith.subf %7, %13 : vector<8x1xf32>
    %cst_7 = arith.constant 0.000000e+00 : f32
    %15 = vector.broadcast %cst_7 : f32 to vector<8x1xf32>
    %16 = arith.maximumf %14, %15 : vector<8x1xf32>
    %17 = arith.mulf %8, %12 : vector<8x1xf32>
    %18 = arith.addf %3, %17 : vector<8x1xf32>
    %cst_8 = arith.constant 1.000000e+00 : f32
    %19 = vector.broadcast %cst_8 : f32 to vector<8x1xf32>
    %20 = arith.subf %19, %8 : vector<8x1xf32>
    %cst_9 = arith.constant 5.000000e-01 : f32
    %21 = vector.broadcast %cst_9 : f32 to vector<8x1xf32>
    %22 = arith.mulf %21, %20 : vector<8x1xf32>
    %23 = arith.mulf %22, %16 : vector<8x1xf32>
    %24 = arith.addf %18, %23 : vector<8x1xf32>
    %25 = vector.extract_strided_slice %2 {offsets = [0, 16], sizes = [8, 16], strides = [1, 1]} : vector<8x64xf32> to vector<8x16xf32>
    %cst_10 = arith.constant dense<0.000000e+00> : vector<8xf32>
    %26 = vector.multi_reduction <add>, %25, %cst_10 [1] : vector<8x16xf32> to vector<8xf32>
    %27 = vector.shape_cast %26 : vector<8xf32> to vector<8x1xf32>
    %28 = math.sqrt %27 : vector<8x1xf32>
    %29 = vector.extract_strided_slice %1 {offsets = [0, 1], sizes = [8, 1], strides = [1, 1]} : vector<8x4xf32> to vector<8x1xf32>
    %cst_11 = arith.constant 0.899999976 : f32
    %30 = vector.broadcast %cst_11 : f32 to vector<8x1xf32>
    %31 = arith.subf %30, %28 : vector<8x1xf32>
    %cst_12 = arith.constant 0.000000e+00 : f32
    %32 = vector.broadcast %cst_12 : f32 to vector<8x1xf32>
    %33 = arith.maximumf %31, %32 : vector<8x1xf32>
    %cst_13 = arith.constant 1.000000e-01 : f32
    %34 = vector.broadcast %cst_13 : f32 to vector<8x1xf32>
    %35 = arith.subf %28, %34 : vector<8x1xf32>
    %cst_14 = arith.constant 0.000000e+00 : f32
    %36 = vector.broadcast %cst_14 : f32 to vector<8x1xf32>
    %37 = arith.maximumf %35, %36 : vector<8x1xf32>
    %38 = arith.mulf %29, %33 : vector<8x1xf32>
    %39 = arith.addf %24, %38 : vector<8x1xf32>
    %cst_15 = arith.constant 1.000000e+00 : f32
    %40 = vector.broadcast %cst_15 : f32 to vector<8x1xf32>
    %41 = arith.subf %40, %29 : vector<8x1xf32>
    %cst_16 = arith.constant 5.000000e-01 : f32
    %42 = vector.broadcast %cst_16 : f32 to vector<8x1xf32>
    %43 = arith.mulf %42, %41 : vector<8x1xf32>
    %44 = arith.mulf %43, %37 : vector<8x1xf32>
    %45 = arith.addf %39, %44 : vector<8x1xf32>
    %46 = vector.extract_strided_slice %2 {offsets = [0, 32], sizes = [8, 16], strides = [1, 1]} : vector<8x64xf32> to vector<8x16xf32>
    %cst_17 = arith.constant dense<0.000000e+00> : vector<8xf32>
    %47 = vector.multi_reduction <add>, %46, %cst_17 [1] : vector<8x16xf32> to vector<8xf32>
    %48 = vector.shape_cast %47 : vector<8xf32> to vector<8x1xf32>
    %49 = math.sqrt %48 : vector<8x1xf32>
    %50 = vector.extract_strided_slice %1 {offsets = [0, 2], sizes = [8, 1], strides = [1, 1]} : vector<8x4xf32> to vector<8x1xf32>
    %cst_18 = arith.constant 0.899999976 : f32
    %51 = vector.broadcast %cst_18 : f32 to vector<8x1xf32>
    %52 = arith.subf %51, %49 : vector<8x1xf32>
    %cst_19 = arith.constant 0.000000e+00 : f32
    %53 = vector.broadcast %cst_19 : f32 to vector<8x1xf32>
    %54 = arith.maximumf %52, %53 : vector<8x1xf32>
    %cst_20 = arith.constant 1.000000e-01 : f32
    %55 = vector.broadcast %cst_20 : f32 to vector<8x1xf32>
    %56 = arith.subf %49, %55 : vector<8x1xf32>
    %cst_21 = arith.constant 0.000000e+00 : f32
    %57 = vector.broadcast %cst_21 : f32 to vector<8x1xf32>
    %58 = arith.maximumf %56, %57 : vector<8x1xf32>
    %59 = arith.mulf %50, %54 : vector<8x1xf32>
    %60 = arith.addf %45, %59 : vector<8x1xf32>
    %cst_22 = arith.constant 1.000000e+00 : f32
    %61 = vector.broadcast %cst_22 : f32 to vector<8x1xf32>
    %62 = arith.subf %61, %50 : vector<8x1xf32>
    %cst_23 = arith.constant 5.000000e-01 : f32
    %63 = vector.broadcast %cst_23 : f32 to vector<8x1xf32>
    %64 = arith.mulf %63, %62 : vector<8x1xf32>
    %65 = arith.mulf %64, %58 : vector<8x1xf32>
    %66 = arith.addf %60, %65 : vector<8x1xf32>
    %67 = vector.extract_strided_slice %2 {offsets = [0, 48], sizes = [8, 16], strides = [1, 1]} : vector<8x64xf32> to vector<8x16xf32>
    %cst_24 = arith.constant dense<0.000000e+00> : vector<8xf32>
    %68 = vector.multi_reduction <add>, %67, %cst_24 [1] : vector<8x16xf32> to vector<8xf32>
    %69 = vector.shape_cast %68 : vector<8xf32> to vector<8x1xf32>
    %70 = math.sqrt %69 : vector<8x1xf32>
    %71 = vector.extract_strided_slice %1 {offsets = [0, 3], sizes = [8, 1], strides = [1, 1]} : vector<8x4xf32> to vector<8x1xf32>
    %cst_25 = arith.constant 0.899999976 : f32
    %72 = vector.broadcast %cst_25 : f32 to vector<8x1xf32>
    %73 = arith.subf %72, %70 : vector<8x1xf32>
    %cst_26 = arith.constant 0.000000e+00 : f32
    %74 = vector.broadcast %cst_26 : f32 to vector<8x1xf32>
    %75 = arith.maximumf %73, %74 : vector<8x1xf32>
    %cst_27 = arith.constant 1.000000e-01 : f32
    %76 = vector.broadcast %cst_27 : f32 to vector<8x1xf32>
    %77 = arith.subf %70, %76 : vector<8x1xf32>
    %cst_28 = arith.constant 0.000000e+00 : f32
    %78 = vector.broadcast %cst_28 : f32 to vector<8x1xf32>
    %79 = arith.maximumf %77, %78 : vector<8x1xf32>
    %80 = arith.mulf %71, %75 : vector<8x1xf32>
    %81 = arith.addf %66, %80 : vector<8x1xf32>
    %cst_29 = arith.constant 1.000000e+00 : f32
    %82 = vector.broadcast %cst_29 : f32 to vector<8x1xf32>
    %83 = arith.subf %82, %71 : vector<8x1xf32>
    %cst_30 = arith.constant 5.000000e-01 : f32
    %84 = vector.broadcast %cst_30 : f32 to vector<8x1xf32>
    %85 = arith.mulf %84, %83 : vector<8x1xf32>
    %86 = arith.mulf %85, %79 : vector<8x1xf32>
    %87 = arith.addf %81, %86 : vector<8x1xf32>
    %c0_31 = arith.constant 0 : index
    %c0_32 = arith.constant 0 : index
    %88 = vector.load %arg4[%c0_31, %c0_32] : memref<8x1024xf32, #tpu.memory_space<vmem>>, vector<8x256xf32>
    %c0_33 = arith.constant 0 : index
    %c256 = arith.constant 256 : index
    %89 = vector.load %arg4[%c0_33, %c256] : memref<8x1024xf32, #tpu.memory_space<vmem>>, vector<8x256xf32>
    %90 = arith.addf %88, %89 : vector<8x256xf32>
    %c0_34 = arith.constant 0 : index
    %c512 = arith.constant 512 : index
    %91 = vector.load %arg4[%c0_34, %c512] : memref<8x1024xf32, #tpu.memory_space<vmem>>, vector<8x256xf32>
    %92 = arith.addf %90, %91 : vector<8x256xf32>
    %c0_35 = arith.constant 0 : index
    %c768 = arith.constant 768 : index
    %93 = vector.load %arg4[%c0_35, %c768] : memref<8x1024xf32, #tpu.memory_space<vmem>>, vector<8x256xf32>
    %94 = arith.addf %92, %93 : vector<8x256xf32>
    %c0_36 = arith.constant 0 : index
    %c0_37 = arith.constant 0 : index
    %95 = vector.load %arg3[%c0_36, %c0_37] : memref<8x256xf32, #tpu.memory_space<vmem>>, vector<8x256xf32>
    %96 = arith.subf %95, %94 : vector<8x256xf32>
    %97 = arith.mulf %96, %96 : vector<8x256xf32>
    %98 = vector.extract_strided_slice %97 {offsets = [0, 0], sizes = [8, 128], strides = [1, 1]} : vector<8x256xf32> to vector<8x128xf32>
    %99 = vector.extract_strided_slice %97 {offsets = [0, 128], sizes = [8, 128], strides = [1, 1]} : vector<8x256xf32> to vector<8x128xf32>
    %100 = arith.addf %98, %99 : vector<8x128xf32>
    %101 = tpu.iota {dimensions = array<i32: 1>} : vector<8x128xi32>
    %cst_38 = arith.constant 5.000000e-04 : f32
    %102 = vector.broadcast %cst_38 : f32 to vector<8x128xf32>
    %103 = arith.mulf %102, %100 : vector<8x128xf32>
    %c0_i32 = arith.constant 0 : i32
    %104 = vector.broadcast %c0_i32 : i32 to vector<8x128xi32>
    %105 = arith.cmpi eq, %101, %104 : vector<8x128xi32>
    %cst_39 = arith.constant 0.000000e+00 : f32
    %106 = vector.shape_cast %87 : vector<8x1xf32> to vector<8x1xf32>
    %107 = vector.broadcast %106 : vector<8x1xf32> to vector<8x128xf32>
    %108 = vector.broadcast %cst_39 : f32 to vector<8x128xf32>
    %109 = arith.select %105, %107, %108 : vector<8x128xi1>, vector<8x128xf32>
    %110 = arith.addf %103, %109 : vector<8x128xf32>
    %c0_40 = arith.constant 0 : index
    %c0_41 = arith.constant 0 : index
    %111 = vector.load %arg5[%c0_40, %c0_41] : memref<8x128xf32, #tpu.memory_space<vmem>>, vector<8x128xf32>
    tpu.vector_store %arg5[%c0_40, %c0_41], %110 {strides = array<i32>} : memref<8x128xf32, #tpu.memory_space<vmem>>, vector<8x128xf32>,
    return
  }
  func.func @transform_0(%arg0: i32) -> (i32, i32) {
    %c0_i32 = arith.constant 0 : i32
    %c0_i32_0 = arith.constant 0 : i32
    return %arg0, %c0_i32 : i32, i32
  }
  func.func @transform_1(%arg0: i32) -> (i32, i32) {
    %c0_i32 = arith.constant 0 : i32
    %c0_i32_0 = arith.constant 0 : i32
    return %arg0, %c0_i32 : i32, i32
  }
  func.func @transform_2(%arg0: i32) -> (i32, i32) {
    %c0_i32 = arith.constant 0 : i32
    %c0_i32_0 = arith.constant 0 : i32
    return %arg0, %c0_i32 : i32, i32
  }
  func.func @transform_3(%arg0: i32) -> (i32, i32) {
    %c0_i32 = arith.constant 0 : i32
    %c0_i32_0 = arith.constant 0 : i32
    return %arg0, %c0_i32 : i32, i32
  }
  func.func @transform_4(%arg0: i32) -> (i32, i32) {
    %c0_i32 = arith.constant 0 : i32
    %c0_i32_0 = arith.constant 0 : i32
    return %arg0, %c0_i32 : i32, i32
  }
}

</mosaic_0001>

<bundles_post_ra>
// kernel: tpu_custom_call.1
= control target key start
LH: loop header
LB: loop body
LE: loop exit
PB: predicated region body
PF: predicated region fallthrough
CT: control target
= control target key end

     0   :  { %9 = vsyncpa [#allocation3], 0  ;;  %s386_s0 = inlined_call_operand.hbm [shape: f32[8,64], index: 0, kind: input, shape index: {}]   ;;  %s387_s1 = inlined_call_operand.vmem [shape: f32[8,4], index: 1, kind: input, shape index: {}]   ;;  %s388_s2 = inlined_call_operand.vmem [shape: f32[8,256], index: 2, kind: input, shape index: {}]   ;;  %s389_s3 = inlined_call_operand.hbm [shape: f32[8,1024], index: 3, kind: input, shape index: {}]   ;;  %s390_s4 = inlined_call_operand.hbm [shape: f32[8,128], index: 4, kind: output, shape index: {}]  }
   0x1   :  { %10 = vsyncpa [#allocation6], 0 }
   0x2   :  { %11 = vsyncpa [#allocation4], 0  ;;  %s299_s15 = smov [#allocation2]   ;;  %s300_s17 = smov [#allocation5]  }
   0x3   :  { %s18_s16 = sshll.u32 %s299_s15, 4  ;;  %s32_s18 = sshll.u32 %s300_s17, 4  ;;  %s19_s16 = int_to_ptr.vmem [resolvable:$true] %s18_s16  ;;  %s33_s18 = int_to_ptr.vmem [resolvable:$true] %s32_s18 }
   0x4   :  { %s227_s21 = scalar_lea.hbm %s386_s0, 128 }
   0x5   :  { %p228_p0 = scmp.ne.s32.totalorder %s386_s0, %s227_s21  ;;  %p231_p1 = scmp.lt.u32.totalorder %s227_s21, %s386_s0 }
   0x7   :  { %p233_p2 = pnand %p231_p1, %p228_p0 }
   0x9   :  { %236 = shalt.err (!%p233_p2)
}
   0xa   :  { %s237_s26 = scalar_lea.vmem %s19_s16, 128  ;;  %p242_p4 = scmp.lt.s32.totalorder %s19_s16, %s19_s16 }
   0xb   :  { %p238_p3 = scmp.ne.s32.totalorder %s19_s16, %s237_s26  ;;  %p243_p5 = scmp.lt.s32.totalorder %s237_s26, %s237_s26 }
   0xd   :  { %p244_p6 = por %p243_p5, %p242_p4 }
   0xf   :  { %p245_p7 = pnand %p244_p6, %p238_p3 }
  0x11   :  { %248 = shalt.err (!%p245_p7)
}
  0x12   :  { %21 = dma.hbm_to_vmem [thread:$0]  %s386_s0, 128, %s19_s16, [#allocation3]  }
  0x13   :  { %s249_s5 = scalar_lea.hbm %s389_s3, 1024 }
  0x14   :  { %p250_p8 = scmp.ne.s32.totalorder %s389_s3, %s249_s5  ;;  %p253_p9 = scmp.lt.u32.totalorder %s249_s5, %s389_s3 }
  0x16   :  { %p255_p10 = pnand %p253_p9, %p250_p8 }
  0x18   :  { %258 = shalt.err (!%p255_p10)
}
  0x19   :  { %s259_s10 = scalar_lea.vmem %s33_s18, 1024  ;;  %p264_p12 = scmp.lt.s32.totalorder %s33_s18, %s33_s18 }
  0x1a   :  { %p260_p11 = scmp.ne.s32.totalorder %s33_s18, %s259_s10  ;;  %p265_p13 = scmp.lt.s32.totalorder %s259_s10, %s259_s10 }
  0x1c   :  { %p266_p0 = por %p265_p13, %p264_p12 }
  0x1e   :  { %p267_p1 = pnand %p266_p0, %p260_p11 }
  0x20   :  { %270 = shalt.err (!%p267_p1)
}
  0x21   :  { %35 = dma.hbm_to_vmem [thread:$0]  %s389_s3, 1024, %s33_s18, [#allocation6]  }
  0x22   :  { %293 = dma.done.wait [#allocation3], 128  }
  0x23   :  { %294 = vsyncadd [#allocation3], 4294967168 }
  0x24   :  { %295 = dma.done.wait [#allocation6], 1024  }
  0x25   :  { %296 = vsyncadd [#allocation6], 4294966272  ;;  %v42_v0 = vld [vmem:[#allocation2] sm:$0xff]  ;;  %s301_s12 = smov 112   ;;  %s302_s13 = smov 80   ;;  %vm45_vm0 = vcmask 130048  }
  0x26   :  { %v44_v1 = vmul.f32 %v42_v0, %v42_v0  ;;  %s303_s14 = smov 96   ;;  %v361_v12 = vld [vmem:[%s387_s1] sm:$0xff]  ;;  %s304_s1 = smov 127   ;;  %v305_v40 = vmov 0  }
  0x27   :  { %v62_v15 = vsub.f32 1.0, %v361_v12  ;;  %217 = vset.pattern.permute.xlu1 %v305_v40  ;;  %218 = vset.pattern.permute.xlu0 %v305_v40  ;;  %s306_s16 = smov 126   ;;  %s307_s17 = smov 125  }
  0x28   :  { %67 = vrot.lane.b32.xlu0 %v44_v1, %s301_s12  ;;  %125 = vrot.lane.b32.xlu1 %v44_v1, %s302_s13  ;;  %v46_v4 = vsel %vm45_vm0, %v44_v1, 0.0  ;;  %s308_s22 = smov [#allocation7]  }
  0x29   :  { %v63_v22 = vmul.f32 0.5, %v62_v15  ;;  %s193_s23 = sshll.u32 %s308_s22, 4  ;;  %s194_s23 = int_to_ptr.vmem [resolvable:$true] %s193_s23 }
  0x2a   :  { %s271_s24 = scalar_lea.vmem %s194_s23, 128  ;;  %p276_p3 = scmp.lt.s32.totalorder %s194_s23, %s194_s23 }
  0x2b   :  { %p272_p2 = scmp.ne.s32.totalorder %s194_s23, %s271_s24  ;;  %p277_p4 = scmp.lt.s32.totalorder %s271_s24, %s271_s24 }
  0x2c   :  { %96 = vrot.lane.b32.xlu0 %v44_v1, %s303_s14 }
  0x2d   :  { %p278_p5 = por %p277_p4, %p276_p3 }
  0x2f   :  { %p279_p6 = pnand %p278_p5, %p272_p2 }
  0x9a   :  { %v68_v2 = vpop.permute.xlu0 %67  ;;  %v126_v6 = vpop.permute.xlu1 %125 }
  0x9b   :  { %v70_v3 = vsel %vm45_vm0, %v68_v2, 0.0  ;;  %v128_v8 = vsel %vm45_vm0, %v126_v6, 0.0 }
  0x9c   :  { %71 = vadd.xlane.f32.xlu1 %v70_v3 }
  0x9e   :  { %v97_v5 = vpop.permute.xlu0 %96 }
  0x9f   :  { %v99_v7 = vsel %vm45_vm0, %v97_v5, 0.0 }
  0xa0   :  { %100 = vadd.xlane.f32.xlu0 %v99_v7  ;;  %47 = vadd.xlane.f32.xlu1 %v46_v4 }
  0xa4   :  { %129 = vadd.xlane.f32.xlu0 %v128_v8 }
 0x129   :  { %v72_v9 = vpop.xlane.xlu1 %71 }
 0x12a   :  { %219 = vrsqrt.f32 %v72_v9  ;;  %vm75_vm1 = vcmp.eq.f32.partialorder %v72_v9, inf  ;;  %v78_v16 = vand.u32 2147483648, %v72_v9  ;;  %vm77_vm2 = vcmp.eq.f32.partialorder %v72_v9, 0.0 }
 0x12d   :  { %v101_v10 = vpop.xlane.xlu0 %100  ;;  %v48_v49 = vpop.xlane.xlu1 %47 }
 0x12e   :  { %221 = vrsqrt.f32 %v101_v10  ;;  %vm104_vm3 = vcmp.eq.f32.partialorder %v101_v10, inf  ;;  %v107_v24 = vand.u32 2147483648, %v101_v10  ;;  %vm106_vm4 = vcmp.eq.f32.partialorder %v101_v10, 0.0 }
 0x12f   :  { %vm51_vm7 = vcmp.eq.f32.partialorder %v48_v49, inf  ;;  %v54_v52 = vand.u32 2147483648, %v48_v49  ;;  %vm53_vm8 = vcmp.eq.f32.partialorder %v48_v49, 0.0 }
 0x131   :  { %v130_v11 = vpop.xlane.xlu0 %129 }
 0x132   :  { %223 = vrsqrt.f32 %v130_v11  ;;  %vm133_vm5 = vcmp.eq.f32.partialorder %v130_v11, inf  ;;  %v136_v34 = vand.u32 2147483648, %v130_v11  ;;  %vm135_vm6 = vcmp.eq.f32.partialorder %v130_v11, 0.0 }
 0x133   :  { %225 = vrsqrt.f32 %v48_v49 }
 0x134   :  { %v220_v13 = vpop.eup %219 }
 0x135   :  { %v74_v14 = vmul.f32 %v220_v13, %v72_v9  ;;  %v156_v13 = vld [vmem:[#allocation5 + $0x10] sm:$0xff] }
 0x137   :  { %v76_v17 = vsel %vm75_vm1, %v72_v9, %v74_v14  ;;  %v157_v14 = vld [vmem:[#allocation5 + $0x18] sm:$0xff] }
 0x138   :  { %v222_v18 = vpop.eup %221  ;;  %v79_v19 = vsel %vm77_vm2, %v78_v16, %v76_v17  ;;  %v160_v16 = vld [vmem:[#allocation5 + $0x20] sm:$0xff]  ;;  %v161_v17 = vld [vmem:[#allocation5 + $0x28] sm:$0xff] }
 0x139   :  { %v103_v20 = vmul.f32 %v222_v18, %v101_v10  ;;  %v80_v21 = vsub.f32 0.9, %v79_v19  ;;  %v204_v23 = vadd.f32 -0.1, %v79_v19 }
 0x13b   :  { %v81_v25 = vmax.f32 %v80_v21, 0.0  ;;  %v83_v26 = vmax.f32 %v204_v23, 0.0  ;;  %v105_v27 = vsel %vm104_vm3, %v101_v10, %v103_v20  ;;  %v154_v10 = vld [vmem:[#allocation5] sm:$0xff]  ;;  %v164_v20 = vld [vmem:[#allocation5 + $0x30] sm:$0xff]  ;;  %v165_v21 = vld [vmem:[#allocation5 + $0x38] sm:$0xff] }
 0x13c   :  { %v224_v28 = vpop.eup %223  ;;  %v108_v29 = vsel %vm106_vm4, %v107_v24, %v105_v27  ;;  %v168_v24 = vld [vmem:[%s388_s2] sm:$0xff] }
 0x13d   :  { %v132_v30 = vmul.f32 %v224_v28, %v130_v11  ;;  %v84_v31 = vmul.f32 %v81_v25, %v361_v12  ;;  %v90_v32 = vmul.f32 %v83_v26, %v63_v22  ;;  %v205_v33 = vadd.f32 -0.1, %v108_v29  ;;  %v226_v50 = vpop.eup %225  ;;  %v169_v25 = vld [vmem:[%s388_s2 + $0x8] sm:$0xff] }
 0x13e   :  { %v109_v35 = vsub.f32 0.9, %v108_v29  ;;  %v50_v51 = vmul.f32 %v226_v50, %v48_v49 }
 0x13f   :  { %86 = vrot.lane.b32.xlu0 %v84_v31, %s304_s1  ;;  %92 = vrot.lane.b32.xlu1 %v90_v32, %s304_s1  ;;  %v112_v36 = vmax.f32 %v205_v33, 0.0  ;;  %v134_v37 = vsel %vm133_vm5, %v130_v11, %v132_v30  ;;  %v155_v11 = vld [vmem:[#allocation5 + $0x8] sm:$0xff]  ;;  %v175_v30 = vlaneseq }
 0x140   :  { %v110_v38 = vmax.f32 %v109_v35, 0.0  ;;  %v137_v39 = vsel %vm135_vm6, %v136_v34, %v134_v37  ;;  %v52_v53 = vsel %vm51_vm7, %v48_v49, %v50_v51  ;;  %v159_v15 = vadd.f32 %v157_v14, %v155_v11 }
 0x141   :  { %v119_v41 = vmul.f32 %v112_v36, %v63_v22  ;;  %v206_v42 = vadd.f32 -0.1, %v137_v39  ;;  %v138_v43 = vsub.f32 0.9, %v137_v39  ;;  %v55_v54 = vsel %vm53_vm8, %v54_v52, %v52_v53 }
 0x142   :  { %v113_v44 = vmul.f32 %v110_v38, %v361_v12  ;;  %v56_v55 = vsub.f32 0.9, %v55_v54  ;;  %v203_v56 = vadd.f32 -0.1, %v55_v54  ;;  %v163_v19 = vadd.f32 %v161_v17, %v159_v15 }
 0x143   :  { %121 = vrot.lane.b32.xlu0 %v119_v41, %s306_s16  ;;  %v141_v45 = vmax.f32 %v206_v42, 0.0  ;;  %v139_v46 = vmax.f32 %v138_v43, 0.0  ;;  %v176_v32 = vand.u32 127, %v175_v30 }
 0x144   :  { %115 = vrot.lane.b32.xlu1 %v113_v44, %s306_s16  ;;  %v57_v57 = vmax.f32 %v56_v55, 0.0  ;;  %v59_v58 = vmax.f32 %v203_v56, 0.0  ;;  %v167_v23 = vadd.f32 %v165_v21, %v163_v19 }
 0x145   :  { %v148_v47 = vmul.f32 %v141_v45, %v63_v22  ;;  %v142_v48 = vmul.f32 %v139_v46, %v361_v12  ;;  %vm178_vm9 = vcmp.eq.s32.totalorder %v176_v32, 0 }
 0x146   :  { %v60_v59 = vmul.f32 %v57_v57, %v361_v12  ;;  %v64_v60 = vmul.f32 %v63_v22, %v59_v58  ;;  %v158_v12 = vadd.f32 %v156_v13, %v154_v10  ;;  %v171_v27 = vsub.f32 %v169_v25, %v167_v23 }
 0x147   :  { %150 = vrot.lane.b32.xlu0 %v148_v47, %s307_s17 }
 0x148   :  { %144 = vrot.lane.b32.xlu1 %v142_v48, %s307_s17  ;;  %v65_v61 = vadd.f32 %v64_v60, %v60_v59  ;;  %v162_v18 = vadd.f32 %v160_v16, %v158_v12  ;;  %v173_v29 = vmul.f32 %v171_v27, %v171_v27 }
 0x14a   :  { %v166_v22 = vadd.f32 %v164_v20, %v162_v18 }
 0x14c   :  { %v170_v26 = vsub.f32 %v168_v24, %v166_v22 }
 0x14e   :  { %v172_v28 = vmul.f32 %v170_v26, %v170_v26 }
 0x150   :  { %v174_v31 = vadd.f32 %v173_v29, %v172_v28 }
 0x152   :  { %v177_v33 = vmul.f32 0.0005, %v174_v31 }
 0x1b1   :  { %v87_v62 = vpop.permute.xlu0 %86  ;;  %v93_v63 = vpop.permute.xlu1 %92 }
 0x1b2   :  { %v89_v0 = vadd.f32 %v87_v62, %v65_v61 }
 0x1b4   :  { %v95_v1 = vadd.f32 %v93_v63, %v89_v0 }
 0x1b5   :  { %v122_v2 = vpop.permute.xlu0 %121 }
 0x1b6   :  { %v116_v3 = vpop.permute.xlu1 %115 }
 0x1b7   :  { %v118_v4 = vadd.f32 %v116_v3, %v95_v1 }
 0x1b9   :  { %v124_v5 = vadd.f32 %v122_v2, %v118_v4  ;;  %v151_v8 = vpop.permute.xlu0 %150 }
 0x1ba   :  { %v145_v6 = vpop.permute.xlu1 %144 }
 0x1bb   :  { %v147_v7 = vadd.f32 %v145_v6, %v124_v5 }
 0x1bd   :  { %v153_v9 = vadd.f32 %v151_v8, %v147_v7 }
 0x1bf   :  { %181 = vperm.xlu1 %217, %v153_v9  }
 0x23e   :  { %v182_v34 = vpop.permute.xlu1 %181 }
 0x23f   :  { %v184_v35 = vsel %vm178_vm9, %v182_v34, 0.0 }
 0x240   :  { %v185_v36 = vadd.f32 %v184_v35, %v177_v33 }
 0x242   :  { %186 = vst [vmem:[#allocation7] sm:$0xff] %v185_v36 }
 0x243   :  { %282 = shalt.err (!%p279_p6)
}
 0x244   :  { %s283_s26 = scalar_lea.hbm %s390_s4, 128 }
 0x245   :  { %p284_p7 = scmp.ne.s32.totalorder %s390_s4, %s283_s26  ;;  %p287_p8 = scmp.lt.u32.totalorder %s283_s26, %s390_s4 }
 0x247   :  { %p289_p9 = pnand %p287_p8, %p284_p7 }
 0x249   :  { %292 = shalt.err (!%p289_p9)
}
 0x24a   :  { %196 = dma.vmem_to_hbm [thread:$0]  %s194_s23, 128, %s390_s4, [#allocation4]  }
 0x24b   :  { %297 = dma.done.wait [#allocation4], 128  }
 0x24c   :  { %298 = vsyncadd [#allocation4], 4294967168 }
 0x24d   :  { %200 = vsyncpa [#allocation3], 1 }
 0x24e   :  { %201 = vsyncpa [#allocation6], 1 }
 0x24f   :  { %202 = vsyncpa [#allocation4], 1 }

</bundles_post_ra>
